<compile_context>
chip_gen: v5e
topology: v5e:2x2
jax: 0.10.0
libtpu: 0.0.40
codegen_flags: <defaults>
</compile_context>

<pallas_src>
import jax
import jax.numpy as jnp
from jax.experimental import pallas as pl
from jax.experimental.pallas import tpu as pltpu


def _binary_classifier_kernel(x_ref, w_ref, b_ref, o_ref):
    """One batch tile: o[0, t] = sigmoid(sum_d x[t, d] * w[0, d] + b).

    x_ref: (TB, D) VMEM   w_ref: (1, D) VMEM   b_ref: (1,) SMEM   o_ref: (1, TB) VMEM
    """
    prod = x_ref[...] * w_ref[...]                 # VPU broadcast multiply, (TB, D)
    row_sum = jnp.sum(prod, axis=-1)               # XLU cross-lane reduce -> (TB,)
    logits = row_sum + b_ref[0]                    # scalar bias from SMEM
    o_ref[...] = jax.nn.sigmoid(logits)[None, :].astype(o_ref.dtype)  # lane-dense store


def _round_up(n, m):
    return (n + m - 1) // m * m


def _choose_block_b(batch, features):
    # Target >= 512 rows per tile (HBM roofline) while keeping the two
    # pipeline buffers of the x tile (2 * TB * D * 4B) under ~16 MiB so the
    # kernel fits v7x's 32 MiB default-scoped VMEM (and trivially v5e/v6e).
    vmem_budget_bytes = 16 * 1024 * 1024
    max_tb = max(8, (vmem_budget_bytes // (2 * features * 4)) // 8 * 8)
    tb = min(512, max_tb)
    if batch <= tb:
        return _round_up(batch, 8)
    return tb


def binary_classifier_forward(x, weight, bias):
    """x: (B, D) f32, weight: (1, D) f32 (PyTorch Linear layout), bias: (1,) f32."""
    batch, features = x.shape
    x = x.astype(jnp.float32)
    w = weight.reshape(1, features).astype(jnp.float32)   # lane-dense weight row
    b = bias.reshape(1).astype(jnp.float32)               # SMEM scalar

    tb = _choose_block_b(batch, features)
    num_tiles = pl.cdiv(batch, tb)
    batch_pad = num_tiles * tb
    if batch_pad != batch:
        x = jnp.pad(x, ((0, batch_pad - batch), (0, 0)))

    out = pl.pallas_call(
        _binary_classifier_kernel,
        out_shape=jax.ShapeDtypeStruct((num_tiles, tb), jnp.float32),
        grid_spec=pltpu.PrefetchScalarGridSpec(
            num_scalar_prefetch=0,
            grid=(num_tiles,),
            in_specs=[
                pl.BlockSpec((tb, features), lambda i: (i, 0)),        # x tile
                pl.BlockSpec((1, features), lambda i: (0, 0)),         # weight row
                pl.BlockSpec(memory_space=pltpu.MemorySpace.SMEM),     # bias scalar
            ],
            out_specs=pl.BlockSpec((1, tb), lambda i: (i, 0)),         # lane-dense row
        ),
        compiler_params=pltpu.CompilerParams(
            dimension_semantics=("parallel",),   # megacore sharding on v7x
        ),
    )(x, w, b)

    # (num_tiles, tb) row-major matches batch order; drop padded rows.
    return out.reshape(batch_pad, 1)[:batch]


if __name__ == "__main__":
    key = jax.random.PRNGKey(0)
    k_x, k_w, k_b = jax.random.split(key, 3)

    batch, input_size = 8, 32
    x = jax.random.normal(k_x, (batch, input_size), dtype=jnp.float32)

    # Deterministic parameter init (mimics nn.Linear uniform(-1/sqrt(D), 1/sqrt(D))).
    bound = 1.0 / jnp.sqrt(jnp.float32(input_size))
    weight = jax.random.uniform(k_w, (1, input_size), minval=-bound, maxval=bound,
                                dtype=jnp.float32)
    bias = jax.random.uniform(k_b, (1,), minval=-bound, maxval=bound,
                              dtype=jnp.float32)

    out = binary_classifier_forward(x, weight, bias)
    out = jax.block_until_ready(out)

    # Reference check against plain JAX (same math as the PyTorch module).
    ref = jax.nn.sigmoid(x @ weight.T + bias)
    assert out.shape == (batch, 1)
    assert jnp.allclose(out, ref, atol=1e-5, rtol=1e-5)

    print("KERNEL_OK")
</pallas_src>

<mosaic_0001>
module attributes {stable_mosaic.version = 11 : i64} {
  func.func @_binary_classifier_kernel(%arg0: i32, %arg1: memref<8x32xf32, #tpu.memory_space<vmem>>, %arg2: memref<1x32xf32, #tpu.memory_space<vmem>>, %arg3: memref<1xf32, #tpu.memory_space<smem>>, %arg4: memref<1x8xf32, #tpu.memory_space<vmem>>) attributes {dimension_semantics = [#tpu.dimension_semantics<parallel>], iteration_bounds = array<i64: 1>, scalar_prefetch = 0 : i64, scratch_operands = 0 : i64, tpu.core_type = #tpu.core_type<tc>, window_params = [{transform_indices = @transform_0, window_bounds = array<i64: 8, 32>}, {pipeline_mode = #tpu.pipeline_mode<synchronous>, transform_indices = @transform_1, window_bounds = array<i64: 1, 32>}, {transform_indices = @transform_2, window_bounds = array<i64: 1>}, {transform_indices = @transform_3, window_bounds = array<i64: 1, 8>}]} {
    %c0 = arith.constant 0 : index
    %c0_0 = arith.constant 0 : index
    %0 = vector.load %arg1[%c0, %c0_0] : memref<8x32xf32, #tpu.memory_space<vmem>>, vector<8x32xf32>
    %c0_1 = arith.constant 0 : index
    %c0_2 = arith.constant 0 : index
    %1 = vector.load %arg2[%c0_1, %c0_2] : memref<1x32xf32, #tpu.memory_space<vmem>>, vector<1x32xf32>
    %2 = vector.broadcast %1 : vector<1x32xf32> to vector<8x32xf32>
    %3 = arith.mulf %0, %2 : vector<8x32xf32>
    %cst = arith.constant dense<0.000000e+00> : vector<8xf32>
    %4 = vector.multi_reduction <add>, %3, %cst [1] : vector<8x32xf32> to vector<8xf32>
    %c0_3 = arith.constant 0 : index
    %5 = memref.load %arg3[%c0_3] : memref<1xf32, #tpu.memory_space<smem>>
    %6 = vector.broadcast %5 : f32 to vector<8xf32>
    %7 = arith.addf %4, %6 : vector<8xf32>
    %8 = arith.negf %7 : vector<8xf32>
    %9 = math.exp %8 : vector<8xf32>
    %cst_4 = arith.constant 1.000000e+00 : f32
    %10 = vector.broadcast %cst_4 : f32 to vector<8xf32>
    %11 = arith.addf %10, %9 : vector<8xf32>
    %12 = arith.divf %10, %11 : vector<8xf32>
    %13 = vector.shape_cast %12 : vector<8xf32> to vector<1x8xf32>
    %c0_5 = arith.constant 0 : index
    %c0_6 = arith.constant 0 : index
    %14 = vector.load %arg4[%c0_5, %c0_6] : memref<1x8xf32, #tpu.memory_space<vmem>>, vector<1x8xf32>
    tpu.vector_store %arg4[%c0_5, %c0_6], %13 {strides = array<i32>} : memref<1x8xf32, #tpu.memory_space<vmem>>, vector<1x8xf32>,
    return
  }
  func.func @transform_0(%arg0: i32) -> (i32, i32) {
    %c0_i32 = arith.constant 0 : i32
    %c0_i32_0 = arith.constant 0 : i32
    return %arg0, %c0_i32 : i32, i32
  }
  func.func @transform_1(%arg0: i32) -> (i32, i32) {
    %c0_i32 = arith.constant 0 : i32
    %c0_i32_0 = arith.constant 0 : i32
    %c0_i32_1 = arith.constant 0 : i32
    return %c0_i32, %c0_i32_0 : i32, i32
  }
  func.func @transform_2(%arg0: i32) -> i32 {
    %c0_i32 = arith.constant 0 : i32
    %c0_i32_0 = arith.constant 0 : i32
    return %c0_i32 : i32
  }
  func.func @transform_3(%arg0: i32) -> (i32, i32) {
    %c0_i32 = arith.constant 0 : i32
    %c0_i32_0 = arith.constant 0 : i32
    return %arg0, %c0_i32 : i32, i32
  }
}

</mosaic_0001>

<bundles_post_ra>
// kernel: tpu_custom_call.1
= control target key start
LH: loop header
LB: loop body
LE: loop exit
PB: predicated region body
PF: predicated region fallthrough
CT: control target
= control target key end

     0   :  { %9 = vsyncpa [#allocation4], 0  ;;  %s180_s0 = inlined_call_operand.hbm [shape: f32[8,32], index: 0, kind: input, shape index: {}]   ;;  %s181_s1 = inlined_call_operand.vmem [shape: f32[1,32], index: 1, kind: input, shape index: {}]   ;;  %s182_s2 = inlined_call_operand.<no memory space> [shape: f32[1], index: 2, kind: input, shape index: {}]   ;;  %s183_s3 = inlined_call_operand.hbm [shape: f32[1,8], index: 3, kind: output, shape index: {}]  }
   0x1   :  { %10 = vsyncpa [#allocation5], 0  ;;  %s16_s14 = sshll.u32 %s180_s0, 4  ;;  %s146_s15 = smov [#allocation3]   ;;  %s17_s14 = int_to_ptr.hbm [resolvable:$true] %s16_s14 }
   0x2   :  { %s18_s16 = sshll.u32 %s146_s15, 4  ;;  %s19_s16 = int_to_ptr.vmem [resolvable:$true] %s18_s16 }
   0x3   :  { %21 = dma.hbm_to_vmem [thread:$0]  %s17_s14, 128, %s19_s16, [#allocation4]  }
   0x4   :  { %142 = dma.done.wait [#allocation4], 128  }
   0x5   :  { %143 = vsyncadd [#allocation4], 4294967168  ;;  %v30_v0 = vld [vmem:[#allocation3] sm:$0xff]  ;;  %vm36_vm0 = vcmask 261120   ;;  %v41_v4 = vstv %s182_s2  ;;  %v63_v13 = vlaneseq  ;;  %s147_s0 = smov [#allocation6]   ;;  %s76_s22 = sshll.u32 %s183_s3, 4  ;;  %s77_s22 = int_to_ptr.hbm [resolvable:$true] %s76_s22 }
   0x6   :  { %v89_v1 = vld [vmem:[%s181_s1] ss:$0 sm:$0xff]  ;;  %s74_s1 = sshll.u32 %s147_s0, 4  ;;  %vm67_vm5 = vcmask 57344   ;;  %s75_s1 = int_to_ptr.vmem [resolvable:$true] %s74_s1 }
   0x7   :  { %v35_v2 = vmul.f32 %v89_v1, %v30_v0  ;;  %v64_v18 = vand.u32 127, %v63_v13 }
   0x9   :  { %v37_v3 = vsel %vm36_vm0, %v35_v2, 0.0 }
   0xa   :  { %38 = vadd.xlane.f32.xlu0 %v37_v3 }
  0x7d   :  { %v39_v5 = vpop.xlane.xlu0 %38 }
  0x7e   :  { %v42_v6 = vadd.f32 %v41_v4, %v39_v5 }
  0x80   :  { %v86_v7 = vmul.f32 -1.442695, %v42_v6 }
  0x82   :  { %90 = vpow2.f32 %v86_v7 }
  0x88   :  { %v91_v8 = vpop.eup %90 }
  0x89   :  { %v46_v9 = vadd.f32 1.0, %v91_v8 }
  0x8b   :  { %92 = vrcp.f32 %v46_v9  ;;  %v58_v14 = vand.u32 2147483648, %v46_v9  ;;  %v56_v16 = vand.u32 2147483647, %v46_v9  ;;  %vm52_vm2 = vweird.f32 %v46_v9 }
  0x8d   :  { %v59_v19 = vor.u32 1.1754944e-38, %v58_v14  ;;  %vm57_vm4 = vcmp.eq.f32.partialorder %v56_v16, 8.507059e+37 }
  0x91   :  { %v93_v10 = vpop.eup %92 }
  0x92   :  { %v48_v11 = vmul.f32 %v93_v10, %v46_v9  ;;  %vm53_vm1 = vweird.f32 %v93_v10 }
  0x93   :  { %vm54_vm3 = vmor %vm52_vm2, %vm53_vm1 }
  0x94   :  { %v49_v12 = vsub.f32 1.0, %v48_v11 }
  0x96   :  { %v50_v15 = vmul.f32 %v93_v10, %v49_v12 }
  0x98   :  { %v51_v17 = vadd.f32 %v93_v10, %v50_v15 }
  0x9a   :  { %v55_v20 = vsel %vm54_vm3, %v93_v10, %v51_v17 }
  0x9b   :  { %v60_v21 = vsel %vm57_vm4, %v59_v19, %v55_v20 }
  0x9c   :  { %v65_v22 = vperm.slane %v60_v21, %v64_v18 }
  0x9e   :  { %68 = vst.msk [vmem:[#allocation6] sm:$0x1] %vm67_vm5, %v65_v22 }
  0x9f   :  { %79 = dma.vmem_to_hbm [thread:$0]  %s75_s1, 16, %s77_s22, [#allocation5]  }
  0xa0   :  { %144 = dma.done.wait [#allocation5], 16  }
  0xa1   :  { %145 = vsyncadd [#allocation5], 4294967280 }
  0xa2   :  { %84 = vsyncpa [#allocation4], 1 }
  0xa3   :  { %85 = vsyncpa [#allocation5], 1 }

</bundles_post_ra>
